<compile_context>
chip_gen: v7x
topology: tpu7x:2x2x1
jax: 0.10.0
libtpu: 0.0.40
codegen_flags: <defaults>
</compile_context>

<pallas_src>
import jax
import jax.numpy as jnp
from jax.experimental import pallas as pl
from jax.experimental.pallas import tpu as pltpu


def _bias_kernel(x_ref, b_ref, o_ref):
    # x_ref: (TB, Fp), b_ref: (1, Fp) -> broadcast add over the batch tile.
    o_ref[...] = x_ref[...] + b_ref[...]


def _round_up(x, m):
    return ((x + m - 1) // m) * m


def _sublane_for(dtype):
    itemsize = jnp.dtype(dtype).itemsize
    return {4: 8, 2: 16, 1: 32}.get(itemsize, 8)


def bias_forward(x, bias, *, target_block_bytes=4 << 20):
    """out = x + bias.  x: (B, F), bias: (F,).  Mirrors torch `Bias.forward`."""
    B, F = x.shape
    assert bias.shape == (F,), "bias must match trailing feature dim"
    dtype = x.dtype
    itemsize = jnp.dtype(dtype).itemsize
    sublane = _sublane_for(dtype)

    # Lane-dense feature dim: pad to a multiple of 128 so stores are unmasked.
    F_pad = _round_up(F, 128)

    # Batch tile: as many rows as fit the per-block byte budget (dtype-aware
    # sublane multiple), capped at 1024 rows and at the (padded) batch size.
    rows_budget = max(sublane, target_block_bytes // (F_pad * itemsize))
    rows = min(rows_budget, 1024, _round_up(B, sublane))
    TB = max(sublane, (rows // sublane) * sublane)
    B_pad = _round_up(B, TB)

    # Pad inputs if needed (zeros; padded region is sliced off afterwards).
    if (B_pad, F_pad) != (B, F):
        x_p = jnp.pad(x, ((0, B_pad - B), (0, F_pad - F)))
    else:
        x_p = x
    if F_pad != F:
        bias2d = jnp.pad(bias, (0, F_pad - F)).reshape(1, F_pad)
    else:
        bias2d = bias.reshape(1, F_pad)

    grid = (B_pad // TB,)

    out = pl.pallas_call(
        _bias_kernel,
        out_shape=jax.ShapeDtypeStruct((B_pad, F_pad), dtype),
        grid_spec=pltpu.PrefetchScalarGridSpec(
            num_scalar_prefetch=0,
            grid=grid,
            in_specs=[
                # Full-feature, batch-tiled block: one big lane-dense slab.
                pl.BlockSpec((TB, F_pad), lambda i: (i, 0)),
                # Constant block index -> bias fetched once, stays resident.
                pl.BlockSpec((1, F_pad), lambda i: (0, 0)),
            ],
            out_specs=pl.BlockSpec((TB, F_pad), lambda i: (i, 0)),
        ),
        compiler_params=pltpu.CompilerParams(
            # Batch axis is embarrassingly parallel -> megacore sharding on v7x,
            # harmless no-op on single-TC v5e/v6e.
            dimension_semantics=("parallel",),
            vmem_limit_bytes=32 << 20,
        ),
        cost_estimate=pl.CostEstimate(
            flops=B_pad * F_pad,
            transcendentals=0,
            bytes_accessed=2 * B_pad * F_pad * itemsize + F_pad * itemsize,
        ),
    )(x_p, bias2d)

    if (B_pad, F_pad) != (B, F):
        out = out[:B, :F]
    return out


if __name__ == "__main__":
    key = jax.random.PRNGKey(0)
    kx, kb = jax.random.split(key)

    # Real dlshogi policy-head feature dim (9*9*MAX_MOVE_LABEL_NUM = 2187),
    # which is NOT a multiple of 128 -> exercises the padding path.
    B, F = 4, 9 * 9 * 27
    x = jax.random.normal(kx, (B, F), dtype=jnp.float32)
    # The torch module initializes bias to zeros; use a nonzero bias so the
    # broadcast-add is actually exercised.
    bias = jax.random.normal(kb, (F,), dtype=jnp.float32)

    out = bias_forward(x, bias)
    jax.block_until_ready(out)
    ref = x + bias[None, :]
    assert out.shape == (B, F)
    assert jnp.allclose(out, ref, atol=1e-6), "mismatch vs reference (padded path)"

    # Also sanity-check a nicely divisible multi-row shape (no padding path).
    B2, F2 = 64, 256
    x2 = jax.random.normal(kx, (B2, F2), dtype=jnp.float32)
    b2 = jax.random.normal(kb, (F2,), dtype=jnp.float32)
    out2 = bias_forward(x2, b2)
    jax.block_until_ready(out2)
    assert jnp.allclose(out2, x2 + b2[None, :], atol=1e-6), "mismatch vs reference"

    print("KERNEL_OK")
</pallas_src>

<mosaic_0001>
module attributes {stable_mosaic.version = 11 : i64} {
  func.func @_bias_kernel(%arg0: i32, %arg1: memref<8x2304xf32, #tpu.memory_space<vmem>>, %arg2: memref<1x2304xf32, #tpu.memory_space<vmem>>, %arg3: memref<8x2304xf32, #tpu.memory_space<vmem>>) attributes {dimension_semantics = [#tpu.dimension_semantics<parallel>], iteration_bounds = array<i64: 1>, scalar_prefetch = 0 : i64, scratch_operands = 0 : i64, tpu.core_type = #tpu.core_type<tc>, window_params = [{transform_indices = @transform_0, window_bounds = array<i64: 8, 2304>}, {pipeline_mode = #tpu.pipeline_mode<synchronous>, transform_indices = @transform_1, window_bounds = array<i64: 1, 2304>}, {transform_indices = @transform_2, window_bounds = array<i64: 8, 2304>}]} {
    %c0 = arith.constant 0 : index
    %c0_0 = arith.constant 0 : index
    %0 = vector.load %arg1[%c0, %c0_0] : memref<8x2304xf32, #tpu.memory_space<vmem>>, vector<8x2304xf32>
    %c0_1 = arith.constant 0 : index
    %c0_2 = arith.constant 0 : index
    %1 = vector.load %arg2[%c0_1, %c0_2] : memref<1x2304xf32, #tpu.memory_space<vmem>>, vector<1x2304xf32>
    %2 = vector.broadcast %1 : vector<1x2304xf32> to vector<8x2304xf32>
    %3 = arith.addf %0, %2 : vector<8x2304xf32>
    %c0_3 = arith.constant 0 : index
    %c0_4 = arith.constant 0 : index
    %4 = vector.load %arg3[%c0_3, %c0_4] : memref<8x2304xf32, #tpu.memory_space<vmem>>, vector<8x2304xf32>
    tpu.vector_store %arg3[%c0_3, %c0_4], %3 {strides = array<i32>} : memref<8x2304xf32, #tpu.memory_space<vmem>>, vector<8x2304xf32>,
    return
  }
  func.func @transform_0(%arg0: i32) -> (i32, i32) {
    %c0_i32 = arith.constant 0 : i32
    %c0_i32_0 = arith.constant 0 : i32
    return %arg0, %c0_i32 : i32, i32
  }
  func.func @transform_1(%arg0: i32) -> (i32, i32) {
    %c0_i32 = arith.constant 0 : i32
    %c0_i32_0 = arith.constant 0 : i32
    %c0_i32_1 = arith.constant 0 : i32
    return %c0_i32, %c0_i32_0 : i32, i32
  }
  func.func @transform_2(%arg0: i32) -> (i32, i32) {
    %c0_i32 = arith.constant 0 : i32
    %c0_i32_0 = arith.constant 0 : i32
    return %arg0, %c0_i32 : i32, i32
  }
}

</mosaic_0001>

<bundles_post_ra>
// kernel: tpu_custom_call.1
= control target key start
LH: loop header
LB: loop body
LE: loop exit
PB: predicated region body
PF: predicated region fallthrough
CT: control target
= control target key end

     0   :  { %7 = vsyncpa [#allocation3], 0  ;;  %s341_s0 = inlined_call_operand.hbm [shape: f32[8,2304], index: 0, kind: input, shape index: {}]   ;;  %s342_s1 = inlined_call_operand.hbm [shape: f32[1,2304], index: 1, kind: input, shape index: {}]   ;;  %s343_s2 = inlined_call_operand.hbm [shape: f32[8,2304], index: 2, kind: output, shape index: {}]  }
   0x1   :  { %8 = vsyncpa [#allocation6], 0 }
   0x2   :  { %9 = vsyncpa [#allocation4], 0  ;;  %s277_s9 = smov [#allocation2]   ;;  %s278_s11 = smov [#allocation5]  }
   0x3   :  { %s16_s10 = sshll.u32 %s277_s9, 4  ;;  %s26_s12 = sshll.u32 %s278_s11, 4  ;;  %s17_s10 = int_to_ptr.vmem [resolvable:$true] %s16_s10  ;;  %s27_s12 = int_to_ptr.vmem [resolvable:$true] %s26_s12 }
   0x4   :  { %s205_s15 = scalar_lea.hbm %s341_s0, 2304 }
   0x5   :  { %p206_p0 = scmp.ne.s32.totalorder %s341_s0, %s205_s15  ;;  %p209_p1 = scmp.lt.u32.totalorder %s205_s15, %s341_s0 }
   0x7   :  { %p211_p2 = pnand %p209_p1, %p206_p0 }
   0x9   :  { %214 = shalt.err (!%p211_p2)
}
   0xa   :  { %s215_s20 = scalar_lea.vmem %s17_s10, 2304  ;;  %p220_p4 = scmp.lt.s32.totalorder %s17_s10, %s17_s10 }
   0xb   :  { %p216_p3 = scmp.ne.s32.totalorder %s17_s10, %s215_s20  ;;  %p221_p5 = scmp.lt.s32.totalorder %s215_s20, %s215_s20 }
   0xd   :  { %p222_p6 = por %p221_p5, %p220_p4 }
   0xf   :  { %p223_p7 = pnand %p222_p6, %p216_p3 }
  0x11   :  { %226 = shalt.err (!%p223_p7)
}
  0x12   :  { %19 = dma.hbm_to_vmem [thread:$0]  %s341_s0, 2304, %s17_s10, [#allocation3]  }
  0x13   :  { %s227_s25 = scalar_lea.hbm %s342_s1, 288 }
  0x14   :  { %p228_p8 = scmp.ne.s32.totalorder %s342_s1, %s227_s25  ;;  %p231_p9 = scmp.lt.u32.totalorder %s227_s25, %s342_s1 }
  0x16   :  { %p233_p10 = pnand %p231_p9, %p228_p8 }
  0x18   :  { %236 = shalt.err (!%p233_p10)
}
  0x19   :  { %s237_s30 = scalar_lea.vmem %s27_s12, 288  ;;  %p242_p12 = scmp.lt.s32.totalorder %s27_s12, %s27_s12 }
  0x1a   :  { %p238_p11 = scmp.ne.s32.totalorder %s27_s12, %s237_s30  ;;  %p243_p13 = scmp.lt.s32.totalorder %s237_s30, %s237_s30 }
  0x1c   :  { %p244_p0 = por %p243_p13, %p242_p12 }
  0x1e   :  { %p245_p1 = pnand %p244_p0, %p238_p11 }
  0x20   :  { %248 = shalt.err (!%p245_p1)
}
  0x21   :  { %29 = dma.hbm_to_vmem [thread:$0]  %s342_s1, 288, %s27_s12, [#allocation6]  }
  0x22   :  { %271 = dma.done.wait [#allocation3], 2304  }
  0x23   :  { %272 = vsyncadd [#allocation3], 4294964992 }
  0x24   :  { %273 = dma.done.wait [#allocation6], 288  }
  0x25   :  { %274 = vsyncadd [#allocation6], 4294967008  ;;  %v60_v0 = vlaneseq  ;;  %v36_v10 = vld [vmem:[#allocation2] sm:$0xff]  ;;  %v54_v11 = vld [vmem:[#allocation5] sm:$0xff]  ;;  %s279_s1 = smov [#allocation7]  }
  0x26   :  { %v37_v12 = vld [vmem:[#allocation2 + $0x8] sm:$0xff]  ;;  %v38_v15 = vld [vmem:[#allocation2 + $0x10] sm:$0xff]  ;;  %v39_v17 = vld [vmem:[#allocation2 + $0x18] sm:$0xff]  ;;  %s192_s4 = sshll.u32 %s279_s1, 4  ;;  %s193_s4 = int_to_ptr.vmem [resolvable:$true] %s192_s4 }
  0x27   :  { %v61_v1 = vshrl.u32 %v60_v0, 7  ;;  %v40_v19 = vld [vmem:[#allocation2 + $0x20] sm:$0xff]  ;;  %v41_v21 = vld [vmem:[#allocation2 + $0x28] sm:$0xff]  ;;  %v42_v23 = vld [vmem:[#allocation2 + $0x30] sm:$0xff]  ;;  %s249_s5 = scalar_lea.vmem %s193_s4, 2304  ;;  %p254_p3 = scmp.lt.s32.totalorder %s193_s4, %s193_s4 }
  0x28   :  { %v43_v25 = vld [vmem:[#allocation2 + $0x38] sm:$0xff]  ;;  %v44_v31 = vld [vmem:[#allocation2 + $0x40] sm:$0xff]  ;;  %v45_v33 = vld [vmem:[#allocation2 + $0x48] sm:$0xff]  ;;  %p250_p2 = scmp.ne.s32.totalorder %s193_s4, %s249_s5  ;;  %p255_p4 = scmp.lt.s32.totalorder %s249_s5, %s249_s5 }
  0x29   :  { %v319_v2 = vsub.s32 0, %v61_v1  ;;  %v321_v3 = vsub.s32 1, %v61_v1  ;;  %v70_v4 = vsub.s32 2, %v61_v1  ;;  %v74_v5 = vsub.s32 3, %v61_v1  ;;  %v55_v32 = vld [vmem:[#allocation5 + $0x8] sm:$0xff]  ;;  %v46_v38 = vld [vmem:[#allocation2 + $0x50] sm:$0xff] }
  0x2a   :  { %v78_v6 = vsub.s32 4, %v61_v1  ;;  %v82_v7 = vsub.s32 5, %v61_v1  ;;  %v86_v8 = vsub.s32 6, %v61_v1  ;;  %v90_v9 = vsub.s32 7, %v61_v1  ;;  %v47_v39 = vld [vmem:[#allocation2 + $0x58] sm:$0xff]  ;;  %v48_v40 = vld [vmem:[#allocation2 + $0x60] sm:$0xff]  ;;  %p256_p5 = por %p255_p4, %p254_p3 }
  0x2b   :  { %v63_v13 = vrot.slane %v54_v11, %v319_v2  ;;  %v67_v14 = vrot.slane %v54_v11, %v321_v3  ;;  %v71_v16 = vrot.slane %v54_v11, %v70_v4  ;;  %v75_v18 = vrot.slane %v54_v11, %v74_v5  ;;  %v49_v45 = vld [vmem:[#allocation2 + $0x68] sm:$0xff]  ;;  %v50_v46 = vld [vmem:[#allocation2 + $0x70] sm:$0xff]  ;;  %v51_v47 = vld [vmem:[#allocation2 + $0x78] sm:$0xff] }
  0x2c   :  { %v79_v20 = vrot.slane %v54_v11, %v78_v6  ;;  %v83_v22 = vrot.slane %v54_v11, %v82_v7  ;;  %v87_v24 = vrot.slane %v54_v11, %v86_v8  ;;  %v91_v26 = vrot.slane %v54_v11, %v90_v9  ;;  %v56_v52 = vld [vmem:[#allocation5 + $0x10] sm:$0x3]  ;;  %v53_v62 = vld [vmem:[#allocation2 + $0x88] sm:$0xff]  ;;  %p257_p6 = pnand %p256_p5, %p250_p2 }
  0x2d   :  { %v150_v27 = vadd.f32 %v63_v13, %v36_v10  ;;  %v151_v28 = vadd.f32 %v67_v14, %v37_v12  ;;  %v152_v29 = vadd.f32 %v71_v16, %v38_v15  ;;  %v153_v30 = vadd.f32 %v75_v18, %v39_v17  ;;  %v52_v61 = vld [vmem:[#allocation2 + $0x80] sm:$0xff] }
  0x2e   :  { %v154_v34 = vadd.f32 %v79_v20, %v40_v19  ;;  %v155_v35 = vadd.f32 %v83_v22, %v41_v21  ;;  %v156_v36 = vadd.f32 %v87_v24, %v42_v23  ;;  %v157_v37 = vadd.f32 %v91_v26, %v43_v25 }
  0x2f   :  { %168 = vst [vmem:[#allocation7] sm:$0xff] %v150_v27  ;;  %169 = vst [vmem:[#allocation7 + $0x8] sm:$0xff] %v151_v28  ;;  %v95_v41 = vrot.slane %v55_v32, %v319_v2  ;;  %v99_v42 = vrot.slane %v55_v32, %v321_v3  ;;  %v103_v43 = vrot.slane %v55_v32, %v70_v4 }
  0x30   :  { %170 = vst [vmem:[#allocation7 + $0x10] sm:$0xff] %v152_v29  ;;  %171 = vst [vmem:[#allocation7 + $0x18] sm:$0xff] %v153_v30  ;;  %v107_v44 = vrot.slane %v55_v32, %v74_v5  ;;  %v111_v48 = vrot.slane %v55_v32, %v78_v6  ;;  %v115_v49 = vrot.slane %v55_v32, %v82_v7 }
  0x31   :  { %172 = vst [vmem:[#allocation7 + $0x20] sm:$0xff] %v154_v34  ;;  %173 = vst [vmem:[#allocation7 + $0x28] sm:$0xff] %v155_v35  ;;  %v119_v50 = vrot.slane %v55_v32, %v86_v8  ;;  %v123_v51 = vrot.slane %v55_v32, %v90_v9  ;;  %v158_v53 = vadd.f32 %v95_v41, %v44_v31 }
  0x32   :  { %174 = vst [vmem:[#allocation7 + $0x30] sm:$0xff] %v156_v36  ;;  %175 = vst [vmem:[#allocation7 + $0x38] sm:$0xff] %v157_v37  ;;  %v159_v54 = vadd.f32 %v99_v42, %v45_v33  ;;  %v160_v55 = vadd.f32 %v103_v43, %v46_v38  ;;  %v161_v56 = vadd.f32 %v107_v44, %v47_v39 }
  0x33   :  { %v162_v57 = vadd.f32 %v111_v48, %v48_v40  ;;  %v163_v58 = vadd.f32 %v115_v49, %v49_v45  ;;  %v164_v59 = vadd.f32 %v119_v50, %v50_v46  ;;  %v165_v60 = vadd.f32 %v123_v51, %v51_v47  ;;  %176 = vst [vmem:[#allocation7 + $0x40] sm:$0xff] %v158_v53 }
  0x34   :  { %177 = vst [vmem:[#allocation7 + $0x48] sm:$0xff] %v159_v54  ;;  %178 = vst [vmem:[#allocation7 + $0x50] sm:$0xff] %v160_v55  ;;  %v127_v63 = vrot.slane %v56_v52, %v319_v2  ;;  %v131_v0 = vrot.slane %v56_v52, %v321_v3 }
  0x35   :  { %179 = vst [vmem:[#allocation7 + $0x58] sm:$0xff] %v161_v56  ;;  %180 = vst [vmem:[#allocation7 + $0x60] sm:$0xff] %v162_v57 }
  0x36   :  { %181 = vst [vmem:[#allocation7 + $0x68] sm:$0xff] %v163_v58  ;;  %182 = vst [vmem:[#allocation7 + $0x70] sm:$0xff] %v164_v59  ;;  %v166_v1 = vadd.f32 %v127_v63, %v52_v61  ;;  %v167_v4 = vadd.f32 %v131_v0, %v53_v62 }
  0x37   :  { %183 = vst [vmem:[#allocation7 + $0x78] sm:$0xff] %v165_v60 }
  0x38   :  { %184 = vst [vmem:[#allocation7 + $0x80] sm:$0xff] %v166_v1  ;;  %185 = vst [vmem:[#allocation7 + $0x88] sm:$0xff] %v167_v4 }
  0x39   :  { %260 = shalt.err (!%p257_p6)
}
  0x3a   :  { %s261_s8 = scalar_lea.hbm %s343_s2, 2304 }
  0x3b   :  { %p262_p7 = scmp.ne.s32.totalorder %s343_s2, %s261_s8  ;;  %p265_p8 = scmp.lt.u32.totalorder %s261_s8, %s343_s2 }
  0x3d   :  { %p267_p9 = pnand %p265_p8, %p262_p7 }
  0x3f   :  { %270 = shalt.err (!%p267_p9)
}
  0x40   :  { %195 = dma.vmem_to_hbm [thread:$0]  %s193_s4, 2304, %s343_s2, [#allocation4]  }
  0x41   :  { %275 = dma.done.wait [#allocation4], 2304  }
  0x42   :  { %276 = vsyncadd [#allocation4], 4294964992 }
  0x43   :  { %199 = vsyncpa [#allocation3], 1 }
  0x44   :  { %200 = vsyncpa [#allocation6], 1 }
  0x45   :  { %201 = vsyncpa [#allocation4], 1 }

</bundles_post_ra>
